<compile_context>
chip_gen: v7x
topology: tpu7x:2x2x1
jax: 0.10.0
libtpu: 0.0.40
codegen_flags: <defaults>
</compile_context>

<pallas_src>
import jax
import jax.numpy as jnp
from jax.experimental import pallas as pl
from jax.experimental.pallas import tpu as pltpu


_TARGET_TILE_BYTES = 4 << 20   # ~4 MiB tiles: ~88-93% of HBM roofline on v7x,
                               # past the knee on v6e, fine on v5e with raised VMEM.
_SPLIT_MIN_BYTES = 1 << 20     # below this, one block: per-step overhead dominates.
_VMEM_LIMIT_BYTES = 48 << 20   # raised scoped-VMEM budget when big tiles are used.


def _round_up(a: int, b: int) -> int:
    return (a + b - 1) // b * b


def _sublane_pack(dtype) -> int:
    # Minimal sublane multiple so a non-final tile never hits packed masked stores.
    return {4: 8, 2: 16, 1: 32}.get(jnp.dtype(dtype).itemsize, 8)


def _add_one_kernel(x_ref, o_ref):
    # Elementwise hot path: one VPU add per vreg, full-width unmasked stores.
    o_ref[...] = x_ref[...] + jnp.asarray(1, dtype=x_ref.dtype)


def _add_one_impl(x: jax.Array) -> jax.Array:
    orig_shape = x.shape
    n = x.size
    if n == 0:
        return x

    itemsize = jnp.dtype(x.dtype).itemsize
    sub = _sublane_pack(x.dtype)
    flat = x.reshape(-1)

    # ---- Lane-dense width that divides n exactly (no pad, no tail slice) ----
    lanes = None
    for cand in (512, 256, 128):
        if n % cand == 0:
            lanes = cand
            break
    if lanes is None:
        # Rare fallback (n not a multiple of 128): minimal pad to one 512-lane
        # row.  Only this path pays an extra pad + tail-slice HBM pass.
        lanes = 512
        padded_n = _round_up(n, lanes)
        flat = jnp.pad(flat, (0, padded_n - n))
    else:
        padded_n = n

    rows = padded_n // lanes
    slab = flat.reshape(rows, lanes)          # reshape of contiguous data: free

    # ---- Row tiling (rows are never padded; boundary block is masked) -------
    row_bytes = lanes * itemsize
    target_rows = max(sub, (_TARGET_TILE_BYTES // row_bytes) // sub * sub)

    if rows > target_rows:
        block_rows = target_rows              # many steps, ~4 MiB tiles
    elif padded_n * itemsize >= _SPLIT_MIN_BYTES and rows >= 2 * sub:
        # Medium input that fits one tile: split into ~8 steps so both v7x
        # TensorCores stream (neutral on single-core v5e/v6e).
        block_rows = max(sub, _round_up(pl.cdiv(rows, 8), sub))
    else:
        block_rows = rows                     # single full-extent block (exempt
                                              # from the (8,128) rule)

    grid = (pl.cdiv(rows, block_rows),)

    # Double-buffered in + out.  Raise the scoped-VMEM limit only when the
    # footprint would not fit v5e's 16 MiB default.
    footprint = 4 * block_rows * lanes * itemsize
    compiler_params = pltpu.CompilerParams(
        dimension_semantics=("parallel",),
        vmem_limit_bytes=_VMEM_LIMIT_BYTES if footprint > (12 << 20) else None,
    )

    out = pl.pallas_call(
        _add_one_kernel,
        out_shape=jax.ShapeDtypeStruct((rows, lanes), x.dtype),
        grid=grid,
        in_specs=[pl.BlockSpec((block_rows, lanes), lambda i: (i, 0))],
        out_specs=pl.BlockSpec((block_rows, lanes), lambda i: (i, 0)),
        compiler_params=compiler_params,
    )(slab)

    if padded_n != n:
        return out.reshape(-1)[:n].reshape(orig_shape)
    return out.reshape(orig_shape)


add_one = jax.jit(_add_one_impl)


if __name__ == "__main__":
    key = jax.random.PRNGKey(0)
    x = jax.random.normal(key, (2, 4, 16, 16), dtype=jnp.float32)

    y = add_one(x)
    y = jax.block_until_ready(y)

    # Correctness against the reference semantics (y = x + 1).
    assert y.shape == x.shape and y.dtype == x.dtype
    assert jnp.allclose(y, x + 1.0)

    print("KERNEL_OK")
</pallas_src>

<mosaic_0001>
module attributes {stable_mosaic.version = 11 : i64} {
  func.func @_add_one_kernel(%arg0: i32, %arg1: memref<4x512xf32, #tpu.memory_space<vmem>>, %arg2: memref<4x512xf32, #tpu.memory_space<vmem>>) attributes {dimension_semantics = [#tpu.dimension_semantics<parallel>], iteration_bounds = array<i64: 1>, scalar_prefetch = 0 : i64, scratch_operands = 0 : i64, tpu.core_type = #tpu.core_type<tc>, window_params = [{transform_indices = @transform_0, window_bounds = array<i64: 4, 512>}, {transform_indices = @transform_1, window_bounds = array<i64: 4, 512>}]} {
    %c0 = arith.constant 0 : index
    %c0_0 = arith.constant 0 : index
    %0 = vector.load %arg1[%c0, %c0_0] : memref<4x512xf32, #tpu.memory_space<vmem>>, vector<4x512xf32>
    %cst = arith.constant 1.000000e+00 : f32
    %1 = vector.broadcast %cst : f32 to vector<4x512xf32>
    %2 = arith.addf %0, %1 : vector<4x512xf32>
    %c0_1 = arith.constant 0 : index
    %c0_2 = arith.constant 0 : index
    %3 = vector.load %arg2[%c0_1, %c0_2] : memref<4x512xf32, #tpu.memory_space<vmem>>, vector<4x512xf32>
    tpu.vector_store %arg2[%c0_1, %c0_2], %2 {strides = array<i32>} : memref<4x512xf32, #tpu.memory_space<vmem>>, vector<4x512xf32>,
    return
  }
  func.func @transform_0(%arg0: i32) -> (i32, i32) {
    %c0_i32 = arith.constant 0 : i32
    %c0_i32_0 = arith.constant 0 : i32
    return %arg0, %c0_i32 : i32, i32
  }
  func.func @transform_1(%arg0: i32) -> (i32, i32) {
    %c0_i32 = arith.constant 0 : i32
    %c0_i32_0 = arith.constant 0 : i32
    return %arg0, %c0_i32 : i32, i32
  }
}

</mosaic_0001>

<bundles_post_ra>
// kernel: _add_one_impl.1
= control target key start
LH: loop header
LB: loop body
LE: loop exit
PB: predicated region body
PF: predicated region fallthrough
CT: control target
= control target key end

     0   :  { %s40_s0 = inlined_call_operand.vmem [shape: f32[4,512], index: 0, kind: input, shape index: {}]   ;;  %s41_s1 = inlined_call_operand.vmem [shape: f32[4,512], index: 1, kind: output, shape index: {}]  }
   0x1   :  { %v8_v0 = vld [vmem:[%s40_s0] sm:$0xff]  ;;  %v9_v1 = vld [vmem:[%s40_s0 + $0x8] sm:$0xff] }
   0x2   :  { %v10_v2 = vadd.f32 1.0, %v8_v0  ;;  %v11_v3 = vadd.f32 1.0, %v9_v1 }
   0x4   :  { %12 = vst [vmem:[%s41_s1] sm:$0xff] %v10_v2  ;;  %13 = vst [vmem:[%s41_s1 + $0x8] sm:$0xff] %v11_v3 }

</bundles_post_ra>
